<compile_context>
chip_gen: v5e
topology: v5e:2x2
jax: 0.10.0
libtpu: 0.0.40
codegen_flags: <defaults>
</compile_context>

<pallas_src>
import jax
import jax.numpy as jnp
from jax.experimental import pallas as pl
from jax.experimental.pallas import tpu as pltpu


def vcn_forward_kernel(x_ref, m_ref, w1_ref, b1_ref, w2_ref, b2_ref, q_ref):
    # x_ref:  (TB, D)  x-dtype  batch tile of features
    # m_ref:  (1, TB)  int32    packed boundary masks: bit1 = a ("in A"), bit0 = b ("in B")
    # w1_ref: (D, H)   x-dtype  first linear weight      (grid-constant)
    # b1_ref: (1, H)   float32  first linear bias        (grid-constant)
    # w2_ref: (1, H)   float32  second linear weight, stored as a row (grid-constant)
    # b2_ref: (1,)     float32  second linear bias, scalar in SMEM
    # q_ref:  (1, TB)  float32  lane-dense committor output row
    x = x_ref[...]                                              # (TB, D)

    # Lobe: Linear(D->H) -> ReLU  (MXU matmul, f32 accumulation regardless of x dtype)
    h = jnp.dot(x, w1_ref[...], preferred_element_type=jnp.float32)
    h = jnp.maximum(h + b1_ref[...], 0.0)                       # (TB, H) f32

    # Linear(H->1): (1,H) . (TB,H)^T contraction so the result is already a
    # lane-dense (1, TB) row (same pattern as q.k^T in attention); no
    # column->row relayout before the store.  The kernel is memory-bound, so
    # a fully transposed (H, TB) dataflow (lane-dense bias+ReLU) is not worth
    # the extra in-kernel x transpose at these small H/D.
    logits = jax.lax.dot_general(
        w2_ref[...], h,
        dimension_numbers=(((1,), (1,)), ((), ())),
        preferred_element_type=jnp.float32,
    ) + b2_ref[0]                                               # (1, TB)

    # Sigmoid.  exp goes to the EUP slot; reciprocal kept exact (approx=True
    # error would exceed the 1e-5 tolerance of the f32 check).
    u = pl.reciprocal(1.0 + jnp.exp(-logits), approx=False)     # (1, TB)

    # q = where(a, 0, where(b, 1, u))   (a has priority over b, as in PyTorch)
    m = m_ref[...]                                              # (1, TB) int32
    a_mask = (m & 2) != 0
    b_mask = (m & 1) != 0
    q_ref[...] = jnp.where(a_mask, 0.0, jnp.where(b_mask, 1.0, u))


def _choose_batch_tile(batch, max_tile):
    """Pick a lane-aligned (multiple of 128) batch tile: as large as possible
    to amortize the ~0.35us/step grid overhead, while keeping the grid >= 2
    steps and even so both v7x TensorCores get balanced work."""
    max_tile = max(128, (max_tile // 128) * 128)
    n_steps = max(2, pl.cdiv(batch, max_tile))
    if n_steps % 2:
        n_steps += 1
    tile = max(128, ((pl.cdiv(batch, n_steps) + 127) // 128) * 128)
    return tile, pl.cdiv(batch, tile)


def vcn_forward(x, a, b, w1, b1, w2, b2, *, max_batch_tile=4096):
    """Committor forward pass q = where(a, 0, where(b, 1, lobe(x))).

    x may be f32 or bf16 (bf16 halves the dominant HBM stream; accumulation
    stays f32).  a / b are boolean (or 0/1) boundary indicators of shape (B, 1).
    """
    B, D = x.shape
    H = w1.shape[1]

    tile, n_tiles = _choose_batch_tile(B, max_batch_tile)

    # Pack both boundary masks into one lane-dense int32 row (bit1=a, bit0=b):
    # one fused wrapper elementwise op, one tiny mask DMA stream per step.
    m = ((a.reshape(1, B) != 0).astype(jnp.int32) * 2
         + (b.reshape(1, B) != 0).astype(jnp.int32))

    # Kernel-friendly layouts for the (tiny) lobe parameters.
    w1_k = w1.astype(x.dtype)                        # (D, H); matmul dtype follows x
    b1_row = b1.reshape(1, H).astype(jnp.float32)    # (1, H)
    w2_row = w2.reshape(1, H).astype(jnp.float32)    # (1, H)  H->1 weight as a row
    b2_s = jnp.asarray(b2, jnp.float32).reshape(1)   # (1,) scalar for SMEM

    # Per-step VMEM estimate (double-buffered x / mask / out + resident weights).
    itemsize = jnp.dtype(x.dtype).itemsize
    vmem_est = (2 * tile * D * itemsize              # x tiles (double-buffered)
                + 2 * tile * 4 + 2 * tile * 4        # mask row + output row
                + D * H * itemsize + 8 * H * 4)      # weights / biases
    compiler_kwargs = {}
    if vmem_est > 24 * 1024 * 1024:                  # above the smallest scoped default
        compiler_kwargs["vmem_limit_bytes"] = min(int(vmem_est * 1.5), 112 * 1024 * 1024)

    q_row = pl.pallas_call(
        vcn_forward_kernel,
        out_shape=jax.ShapeDtypeStruct((1, B), jnp.float32),
        grid_spec=pltpu.PrefetchScalarGridSpec(
            num_scalar_prefetch=0,
            grid=(n_tiles,),
            in_specs=[
                pl.BlockSpec((tile, D), lambda i: (i, 0)),            # x tile (ragged tail OK)
                pl.BlockSpec((1, tile), lambda i: (0, i)),            # packed masks (lane-dense)
                pl.BlockSpec((D, H), lambda i: (0, 0)),               # w1 (grid-constant)
                pl.BlockSpec((1, H), lambda i: (0, 0)),               # b1
                pl.BlockSpec((1, H), lambda i: (0, 0)),               # w2 row
                pl.BlockSpec(memory_space=pltpu.MemorySpace.SMEM),    # b2 scalar
            ],
            out_specs=pl.BlockSpec((1, tile), lambda i: (0, i)),      # lane-dense q row
        ),
        compiler_params=pltpu.CompilerParams(
            dimension_semantics=("parallel",),   # independent batch tiles (megacore)
            **compiler_kwargs,
        ),
    )(x, m, w1_k, b1_row, w2_row, b2_s)

    # PyTorch-shaped (B, 1) committor.  (1,B)->(B,1) on contiguous data is a
    # cheap reshape; consumers that can take the row layout may skip it.
    return q_row.reshape(B, 1)


def vcn_forward_ref(x, a, b, w1, b1, w2, b2):
    """Plain-JAX reference mirroring the PyTorch semantics (f32 lobe)."""
    h = jnp.maximum(
        jnp.dot(x.astype(jnp.float32), w1,
                precision=jax.lax.Precision.HIGHEST) + b1, 0.0)
    u = jax.nn.sigmoid(
        jnp.dot(h, w2, precision=jax.lax.Precision.HIGHEST) + b2)
    return jnp.where(a != 0, 0.0, jnp.where(b != 0, 1.0, u))


if __name__ == "__main__":
    key = jax.random.PRNGKey(0)
    # Batch is intentionally NOT a tile multiple -> exercises the ragged tail path.
    B, D, H = 1000, 32, 32

    k_x, k_a, k_b, k_w1, k_b1, k_w2, k_b2 = jax.random.split(key, 7)

    x = jax.random.normal(k_x, (B, D), dtype=jnp.float32)
    # Boundary masks: a = in state A, b = in state B (mutually exclusive here).
    a = jax.random.uniform(k_a, (B, 1)) < 0.25
    b = (jax.random.uniform(k_b, (B, 1)) < 0.25) & (~a)

    # Deterministic lobe parameters (Linear(D,H) -> ReLU -> Linear(H,1) -> Sigmoid).
    w1 = jax.random.normal(k_w1, (D, H), dtype=jnp.float32) * (1.0 / jnp.sqrt(D))
    b1 = jax.random.normal(k_b1, (1, H), dtype=jnp.float32) * 0.01
    w2 = jax.random.normal(k_w2, (H, 1), dtype=jnp.float32) * (1.0 / jnp.sqrt(H))
    b2 = jax.random.normal(k_b2, (1, 1), dtype=jnp.float32) * 0.01

    q_ref = vcn_forward_ref(x, a, b, w1, b1, w2, b2)

    # f32 path (matches the f32 reference to tight tolerance).  grid = (2,).
    q = jax.block_until_ready(vcn_forward(x, a, b, w1, b1, w2, b2))
    assert q.shape == (B, 1)
    assert jnp.allclose(q, q_ref, atol=1e-5, rtol=1e-5), (
        float(jnp.max(jnp.abs(q - q_ref))))

    # bf16-feature path: halves the dominant HBM stream (x), f32 accumulation.
    # (The cast here is only for the demo -- in production supply bf16 features
    # directly instead of casting right before the call.)
    q_bf16 = jax.block_until_ready(
        vcn_forward(x.astype(jnp.bfloat16), a, b,
                    w1.astype(jnp.bfloat16), b1, w2, b2))
    assert q_bf16.shape == (B, 1)
    assert jnp.allclose(q_bf16, q_ref, atol=2e-2), (
        float(jnp.max(jnp.abs(q_bf16 - q_ref))))

    print("KERNEL_OK")
</pallas_src>

<mosaic_0001>
module attributes {stable_mosaic.version = 11 : i64} {
  func.func @vcn_forward_kernel(%arg0: i32, %arg1: memref<512x32xf32, #tpu.memory_space<vmem>>, %arg2: memref<1x512xi32, #tpu.memory_space<vmem>>, %arg3: memref<32x32xf32, #tpu.memory_space<vmem>>, %arg4: memref<1x32xf32, #tpu.memory_space<vmem>>, %arg5: memref<1x32xf32, #tpu.memory_space<vmem>>, %arg6: memref<1xf32, #tpu.memory_space<smem>>, %arg7: memref<1x512xf32, #tpu.memory_space<vmem>>) attributes {dimension_semantics = [#tpu.dimension_semantics<parallel>], iteration_bounds = array<i64: 2>, scalar_prefetch = 0 : i64, scratch_operands = 0 : i64, tpu.core_type = #tpu.core_type<tc>, window_params = [{transform_indices = @transform_0, window_bounds = array<i64: 512, 32>}, {transform_indices = @transform_1, window_bounds = array<i64: 1, 512>}, {pipeline_mode = #tpu.pipeline_mode<synchronous>, transform_indices = @transform_2, window_bounds = array<i64: 32, 32>}, {pipeline_mode = #tpu.pipeline_mode<synchronous>, transform_indices = @transform_3, window_bounds = array<i64: 1, 32>}, {pipeline_mode = #tpu.pipeline_mode<synchronous>, transform_indices = @transform_4, window_bounds = array<i64: 1, 32>}, {transform_indices = @transform_5, window_bounds = array<i64: 1>}, {transform_indices = @transform_6, window_bounds = array<i64: 1, 512>}]} {
    %c0 = arith.constant 0 : index
    %c0_0 = arith.constant 0 : index
    %0 = vector.load %arg1[%c0, %c0_0] : memref<512x32xf32, #tpu.memory_space<vmem>>, vector<512x32xf32>
    %c0_1 = arith.constant 0 : index
    %c0_2 = arith.constant 0 : index
    %1 = vector.load %arg3[%c0_1, %c0_2] : memref<32x32xf32, #tpu.memory_space<vmem>>, vector<32x32xf32>
    %cst = arith.constant dense<0.000000e+00> : vector<512x32xf32>
    %2 = tpu.matmul %0, %1, %cst {dimension_numbers = #tpu.dot_dimension_numbers<[1], [0], [0], [1], [0, 0, 1, 1], [], []>} : vector<512x32xf32>, vector<32x32xf32>, vector<512x32xf32> -> vector<512x32xf32>
    %c0_3 = arith.constant 0 : index
    %c0_4 = arith.constant 0 : index
    %3 = vector.load %arg4[%c0_3, %c0_4] : memref<1x32xf32, #tpu.memory_space<vmem>>, vector<1x32xf32>
    %4 = vector.broadcast %3 : vector<1x32xf32> to vector<512x32xf32>
    %5 = arith.addf %2, %4 : vector<512x32xf32>
    %cst_5 = arith.constant 0.000000e+00 : f32
    %6 = vector.broadcast %cst_5 : f32 to vector<512x32xf32>
    %7 = arith.maximumf %5, %6 : vector<512x32xf32>
    %c0_6 = arith.constant 0 : index
    %c0_7 = arith.constant 0 : index
    %8 = vector.load %arg5[%c0_6, %c0_7] : memref<1x32xf32, #tpu.memory_space<vmem>>, vector<1x32xf32>
    %cst_8 = arith.constant dense<0.000000e+00> : vector<1x512xf32>
    %9 = tpu.matmul %8, %7, %cst_8 {dimension_numbers = #tpu.dot_dimension_numbers<[1], [1], [0], [0], [0, 0, 1, 0], [], []>} : vector<1x32xf32>, vector<512x32xf32>, vector<1x512xf32> -> vector<1x512xf32>
    %c0_9 = arith.constant 0 : index
    %10 = memref.load %arg6[%c0_9] : memref<1xf32, #tpu.memory_space<smem>>
    %11 = vector.broadcast %10 : f32 to vector<1x512xf32>
    %12 = arith.addf %9, %11 : vector<1x512xf32>
    %cst_10 = arith.constant 0.000000e+00 : f32
    %13 = vector.broadcast %cst_10 : f32 to vector<1x512xf32>
    %14 = arith.subf %13, %12 : vector<1x512xf32>
    %15 = math.exp %14 : vector<1x512xf32>
    %cst_11 = arith.constant 1.000000e+00 : f32
    %16 = vector.broadcast %cst_11 : f32 to vector<1x512xf32>
    %17 = arith.addf %16, %15 : vector<1x512xf32>
    %18 = tpu.reciprocal %17 : vector<1x512xf32> -> vector<1x512xf32>
    %c0_12 = arith.constant 0 : index
    %c0_13 = arith.constant 0 : index
    %19 = vector.load %arg2[%c0_12, %c0_13] : memref<1x512xi32, #tpu.memory_space<vmem>>, vector<1x512xi32>
    %c2_i32 = arith.constant 2 : i32
    %20 = vector.broadcast %c2_i32 : i32 to vector<1x512xi32>
    %21 = arith.andi %19, %20 : vector<1x512xi32>
    %c0_i32 = arith.constant 0 : i32
    %22 = vector.broadcast %c0_i32 : i32 to vector<1x512xi32>
    %23 = arith.cmpi ne, %21, %22 : vector<1x512xi32>
    %c1_i32 = arith.constant 1 : i32
    %24 = vector.broadcast %c1_i32 : i32 to vector<1x512xi32>
    %25 = arith.andi %19, %24 : vector<1x512xi32>
    %c0_i32_14 = arith.constant 0 : i32
    %26 = vector.broadcast %c0_i32_14 : i32 to vector<1x512xi32>
    %27 = arith.cmpi ne, %25, %26 : vector<1x512xi32>
    %cst_15 = arith.constant 1.000000e+00 : f32
    %28 = vector.broadcast %cst_15 : f32 to vector<1x512xf32>
    %29 = arith.select %27, %28, %18 : vector<1x512xi1>, vector<1x512xf32>
    %cst_16 = arith.constant 0.000000e+00 : f32
    %30 = vector.broadcast %cst_16 : f32 to vector<1x512xf32>
    %31 = arith.select %23, %30, %29 : vector<1x512xi1>, vector<1x512xf32>
    %c0_17 = arith.constant 0 : index
    %c0_18 = arith.constant 0 : index
    %32 = vector.load %arg7[%c0_17, %c0_18] : memref<1x512xf32, #tpu.memory_space<vmem>>, vector<1x512xf32>
    tpu.vector_store %arg7[%c0_17, %c0_18], %31 {strides = array<i32>} : memref<1x512xf32, #tpu.memory_space<vmem>>, vector<1x512xf32>,
    return
  }
  func.func @transform_0(%arg0: i32) -> (i32, i32) {
    %c0_i32 = arith.constant 0 : i32
    %c0_i32_0 = arith.constant 0 : i32
    return %arg0, %c0_i32 : i32, i32
  }
  func.func @transform_1(%arg0: i32) -> (i32, i32) {
    %c0_i32 = arith.constant 0 : i32
    %c0_i32_0 = arith.constant 0 : i32
    return %c0_i32, %arg0 : i32, i32
  }
  func.func @transform_2(%arg0: i32) -> (i32, i32) {
    %c0_i32 = arith.constant 0 : i32
    %c0_i32_0 = arith.constant 0 : i32
    %c0_i32_1 = arith.constant 0 : i32
    return %c0_i32, %c0_i32_0 : i32, i32
  }
  func.func @transform_3(%arg0: i32) -> (i32, i32) {
    %c0_i32 = arith.constant 0 : i32
    %c0_i32_0 = arith.constant 0 : i32
    %c0_i32_1 = arith.constant 0 : i32
    return %c0_i32, %c0_i32_0 : i32, i32
  }
  func.func @transform_4(%arg0: i32) -> (i32, i32) {
    %c0_i32 = arith.constant 0 : i32
    %c0_i32_0 = arith.constant 0 : i32
    %c0_i32_1 = arith.constant 0 : i32
    return %c0_i32, %c0_i32_0 : i32, i32
  }
  func.func @transform_5(%arg0: i32) -> i32 {
    %c0_i32 = arith.constant 0 : i32
    %c0_i32_0 = arith.constant 0 : i32
    return %c0_i32 : i32
  }
  func.func @transform_6(%arg0: i32) -> (i32, i32) {
    %c0_i32 = arith.constant 0 : i32
    %c0_i32_0 = arith.constant 0 : i32
    return %c0_i32, %arg0 : i32, i32
  }
}

</mosaic_0001>

<bundles_post_ra>
// kernel: tpu_custom_call.1
= control target key start
LH: loop header
LB: loop body
LE: loop exit
PB: predicated region body
PF: predicated region fallthrough
CT: control target
= control target key end

     0   :  { %s2136_s0 = inlined_call_operand.vmem [shape: f32[1000,32], index: 0, kind: input, shape index: {}]   ;;  %s2137_s1 = inlined_call_operand.vmem [shape: s32[1,1000], index: 1, kind: input, shape index: {}]   ;;  %s2138_s2 = inlined_call_operand.vmem [shape: f32[32,32], index: 2, kind: input, shape index: {}]   ;;  %s2139_s3 = inlined_call_operand.vmem [shape: f32[1,32], index: 3, kind: input, shape index: {}]   ;;  %s2140_s4 = inlined_call_operand.vmem [shape: f32[1,32], index: 4, kind: input, shape index: {}]   ;;  %s2141_s5 = inlined_call_operand.<no memory space> [shape: f32[1], index: 5, kind: input, shape index: {}]   ;;  %s2142_s6 = inlined_call_operand.hbm [shape: f32[1,1000], index: 6, kind: output, shape index: {}]  }
   0x1   :  { %11 = sst [smem:[#allocation2]] %s2141_s5 }
   0x2   :  { %12 = vsyncpa [#allocation4], 0 }
   0x3   :  { %14 = vsyncpa [#allocation4 + $0x1], 0  ;;  %s1601_s23 = smov 0   ;;  %s1603_s24 = smov 0  }
   0x4   :  { %s1605_s25 = smov 0   ;;  %s1607_s26 = smov 0  }
   0x5 LB: > { %s1622_s5 = sadd.s32 4294967295, %s1561_s26   ;;  %s1291_s27 = sadd.s32 4294967294, %s1561_s26   ;;  %s1561_s26 = sphi %s1607_s26, %s2158_s26   ;;  %s1557_s25 = sphi %s1605_s25, %s2157_s25   ;;  %s1553_s24 = sphi %s1603_s24, %s2156_s24   ;;  %s1549_s23 = sphi %s1601_s23, %s2155_s23  }
   0x6   : > { %s1626_s28 = sadd.s32 1, %s1561_s26   ;;  %s163_s29 = sadd.s32 1, %s1557_s25 }
   0x7   : > { %s160_s30 = ssub.s32 %s1561_s26, %s1626_s28  ;;  %p173_p0 = scmp.ne.s32.totalorder %s1557_s25, %s1553_s24 }
   0x8   : > { %p161_p1 = scmp.eq.s32.totalorder %s160_s30, 0  ;;  %p174_p2 = scmp.eq.s32.totalorder %s1622_s5, 1 }
   0x9   : > { %p179_p3 = scmp.ne.s32.totalorder %s1553_s24, %s1549_s23  ;;  %p180_p4 = scmp.eq.s32.totalorder %s1291_s27, 1 }
   0xa   : > { %s1637_s7 = scalar_select %p161_p1, %s1557_s25, %s163_s29  }
   0xb   : > { %p1639_p5 = por %p174_p2, %p173_p0  ;;  %p1643_p6 = por %p180_p4, %p179_p3 }
   0xc   : > { %p1294_p7 = scmp.ge.s32.totalorder %s1561_s26, 1  ;;  %p235_p8 = scmp.lt.s32.totalorder %s1561_s26, 3 }
   0xe   : > { %p236_p9 = pnand %p1294_p7, %p235_p8 }
   0xf   : > { %s1296_s14 = sshll.u32 (!%p236_p9), %s1622_s5, 6  ;;  %s832_s11 = sld [smem:[#allocation2]] (!%p236_p9) }
  0x10   : > { %239 = sbr.rel (%p236_p9) target bundleno = 573 (0x23d), region = 44  ;;  %p278_p10 = scmp.lt.s32.totalorder (!%p236_p9), %s1296_s14, 124 }
  0x11   : > { %s2053_s12 = sshll.u32 (!%p236_p9), %s1622_s5, 2  ;;  %s270_s16 = sand.u32 (!%p236_p9), 1, %s1553_s24  }
  0x12   : > { %p288_p11 = scmp.lt.s32.totalorder (!%p236_p9), %s2053_s12, 7  ;;  %s2096_s17 = sshll.u32 (!%p236_p9), %s270_s16, 2 }
  0x13   : > { %s1218_s20 = scalar_lea.hbm (!%p236_p9), %s2142_s6, %s2053_s12  ;;  %s272_s21 = scalar_lea.vmem (!%p236_p9), [#allocation3], %s2096_s17 }
  0x14   : > { %s1222_s27 = sshll.u32 (!%p236_p9), %s1218_s20, 4  ;;  %s1208_s29 = scalar_lea.sflag (!%p236_p9), [#allocation4], %s270_s16  ;;  %s1223_s27 = int_to_ptr.hbm [resolvable:$true] %s1222_s27 }
  0x15   : > { %v360_v0 = vld [vmem:[%s2138_s2 + $0x18] sm:$0xff]  ;;  %v359_v1 = vld [vmem:[%s2138_s2 + $0x10] sm:$0xff]  ;;  %v358_v2 = vld [vmem:[%s2138_s2 + $0x8] sm:$0xff]  ;;  %s2160_s14 = smov (!%p278_p10, %s1296_s14), 124  ;;  %vm365_vm0 = vcmask 261120   ;;  %s1513_s30 = sshra.s32 %s1223_s27, 4  ;;  %s1514_s30 = int_to_ptr.hbm [resolvable:$true] %s1513_s30 }
  0x16   : > { %570 = vmatpush.msra.mxu0 %v360_v0  ;;  %1435 = vmatpush.msra.mxu2 %v360_v0  ;;  %v357_v3 = vld [vmem:[%s2138_s2] sm:$0xff]  ;;  %s1297_s19 = sshll.u32 %s2160_s14, 3  ;;  %s1515_s10 = scalar_lea.hbm %s1514_s30, 4 }
  0x17   : > { %1436 = vmatpush.msra.mxu3 %v360_v0  ;;  %s1665_s22 = scalar_lea.vmem %s2136_s0, %s1297_s19  ;;  %p1516_p12 = scmp.ne.s32.totalorder %s1514_s30, %s1515_s10 }
  0x18   : > { %571 = vmatpush.msra.mxu0 %v359_v1  ;;  %1437 = vmatpush.msra.mxu2 %v359_v1  ;;  %v293_v4 = vld [vmem:[%s1665_s22] sm:$0xff]  ;;  %v316_v5 = vld [vmem:[%s1665_s22 + $0xb8] sm:$0xff]  ;;  %v294_v7 = vld [vmem:[%s1665_s22 + $0x8] sm:$0xff]  ;;  %s2059_s13 = scalar_select %p288_p11, %s2053_s12, 7 }
  0x19   : > { %1438 = vmatpush.msra.mxu3 %v359_v1  ;;  %v336_v6 = vld [vmem:[%s1665_s22 + $0x158] sm:$0xff]  ;;  %v317_v8 = vld [vmem:[%s1665_s22 + $0xc0] sm:$0xff]  ;;  %v295_v10 = vld [vmem:[%s1665_s22 + $0x10] sm:$0xff]  ;;  %p1517_p13 = pnand %p1516_p12, %p1639_p5  ;;  %p1520_p1 = scmp.lt.s32.totalorder %s1514_s30, %s2142_s6 }
  0x1a   : > { %572 = vmatpush.msra.mxu0 %v358_v2  ;;  %1439 = vmatpush.msra.mxu2 %v358_v2  ;;  %v337_v9 = vld [vmem:[%s1665_s22 + $0x160] sm:$0xff]  ;;  %v318_v11 = vld [vmem:[%s1665_s22 + $0xc8] sm:$0xff]  ;;  %v296_v13 = vld [vmem:[%s1665_s22 + $0x18] sm:$0xff]  ;;  %s290_s15 = scalar_lea.vmem %s2137_s1, %s2059_s13  ;;  %s1519_s13 = scalar_lea.hbm %s2142_s6, 8 }
  0x1b   : > { %1440 = vmatpush.msra.mxu3 %v358_v2  ;;  %v338_v12 = vld [vmem:[%s1665_s22 + $0x168] sm:$0xff]  ;;  %v319_v14 = vld [vmem:[%s1665_s22 + $0xd0] sm:$0xff]  ;;  %v297_v16 = vld [vmem:[%s1665_s22 + $0x20] sm:$0xff]  ;;  %p1518_p0 = pneg %p1517_p13  ;;  %p1521_p2 = scmp.lt.s32.totalorder %s1519_s13, %s1515_s10 }
  0x1c   : > { %573 = vmatpush.msra.mxu0 %v357_v3  ;;  %1441 = vmatpush.msra.mxu2 %v357_v3  ;;  %v339_v15 = vld [vmem:[%s1665_s22 + $0x170] sm:$0xff]  ;;  %v320_v17 = vld [vmem:[%s1665_s22 + $0xd8] sm:$0xff]  ;;  %v298_v19 = vld [vmem:[%s1665_s22 + $0x28] sm:$0xff] }
  0x1d   : > { %1299 = vmatmul.msk.f32.vlgmr.msra.gmra.mxu0 %vm365_vm0, %v293_v4  ;;  %1322 = vmatmul.msk.f32.vlgmr.msra.gmra.mxu2 %vm365_vm0, %v316_v5  ;;  %v340_v18 = vld [vmem:[%s1665_s22 + $0x178] sm:$0xff]  ;;  %v321_v20 = vld [vmem:[%s1665_s22 + $0xe0] sm:$0xff]  ;;  %v299_v22 = vld [vmem:[%s1665_s22 + $0x30] sm:$0xff]  ;;  %p1522_p3 = por %p1521_p2, %p1520_p1 }
  0x1e   : > { %1442 = vmatpush.msra.mxu3 %v357_v3  ;;  %v341_v21 = vld [vmem:[%s1665_s22 + $0x180] sm:$0xff]  ;;  %v322_v23 = vld [vmem:[%s1665_s22 + $0xe8] sm:$0xff]  ;;  %v300_v25 = vld [vmem:[%s1665_s22 + $0x38] sm:$0xff] }
  0x1f   : > { %1342 = vmatmul.msk.f32.vlgmr.msra.gmra.mxu3 %vm365_vm0, %v336_v6  ;;  %v342_v24 = vld [vmem:[%s1665_s22 + $0x188] sm:$0xff]  ;;  %v323_v26 = vld [vmem:[%s1665_s22 + $0xf0] sm:$0xff]  ;;  %v301_v28 = vld [vmem:[%s1665_s22 + $0x40] sm:$0xff]  ;;  %p1523_p4 = pnand %p1522_p3, %p1518_p0 }
  0x20   : > { %v343_v27 = vld [vmem:[%s1665_s22 + $0x190] sm:$0xff]  ;;  %v324_v29 = vld [vmem:[%s1665_s22 + $0xf8] sm:$0xff]  ;;  %v302_v31 = vld [vmem:[%s1665_s22 + $0x48] sm:$0xff] }
  0x21   : > { %v344_v30 = vld [vmem:[%s1665_s22 + $0x198] sm:$0xff]  ;;  %v325_v32 = vld [vmem:[%s1665_s22 + $0x100] sm:$0xff]  ;;  %v303_v34 = vld [vmem:[%s1665_s22 + $0x50] sm:$0xff] }
  0x22   : > { %v345_v33 = vld [vmem:[%s1665_s22 + $0x1a0] sm:$0xff]  ;;  %v326_v35 = vld [vmem:[%s1665_s22 + $0x108] sm:$0xff]  ;;  %v304_v37 = vld [vmem:[%s1665_s22 + $0x58] sm:$0xff] }
  0x23   : > { %v346_v36 = vld [vmem:[%s1665_s22 + $0x1a8] sm:$0xff]  ;;  %v327_v38 = vld [vmem:[%s1665_s22 + $0x110] sm:$0xff]  ;;  %v305_v40 = vld [vmem:[%s1665_s22 + $0x60] sm:$0xff] }
  0x24   : > { %v347_v39 = vld [vmem:[%s1665_s22 + $0x1b0] sm:$0xff]  ;;  %v328_v41 = vld [vmem:[%s1665_s22 + $0x118] sm:$0xff]  ;;  %v306_v43 = vld [vmem:[%s1665_s22 + $0x68] sm:$0xff] }
  0x25   : > { %1300 = vmatmul.msk.f32.gmra.mxu0 %vm365_vm0, %v294_v7  ;;  %1323 = vmatmul.msk.f32.gmra.mxu2 %vm365_vm0, %v317_v8  ;;  %v348_v42 = vld [vmem:[%s1665_s22 + $0x1b8] sm:$0xff]  ;;  %v329_v44 = vld [vmem:[%s1665_s22 + $0x120] sm:$0xff]  ;;  %v307_v46 = vld [vmem:[%s1665_s22 + $0x70] sm:$0xff] }
  0x26   : > { %v349_v45 = vld [vmem:[%s1665_s22 + $0x1c0] sm:$0xff]  ;;  %v330_v47 = vld [vmem:[%s1665_s22 + $0x128] sm:$0xff]  ;;  %v308_v49 = vld [vmem:[%s1665_s22 + $0x78] sm:$0xff] }
  0x27   : > { %1343 = vmatmul.msk.f32.gmra.mxu3 %vm365_vm0, %v337_v9  ;;  %v350_v48 = vld [vmem:[%s1665_s22 + $0x1c8] sm:$0xff]  ;;  %v331_v50 = vld [vmem:[%s1665_s22 + $0x130] sm:$0xff]  ;;  %v309_v53 = vld [vmem:[%s1665_s22 + $0x80] sm:$0xff] }
  0x28   : > { %v351_v51 = vld [vmem:[%s1665_s22 + $0x1d0] sm:$0xff]  ;;  %v332_v54 = vld [vmem:[%s1665_s22 + $0x138] sm:$0xff]  ;;  %v310_v59 = vld [vmem:[%s1665_s22 + $0x88] sm:$0xff] }
  0x29   : > { %v352_v55 = vld [vmem:[%s1665_s22 + $0x1d8] sm:$0xff]  ;;  %v333_v60 = vld [vmem:[%s1665_s22 + $0x140] sm:$0xff]  ;;  %v311_v1 = vld [vmem:[%s1665_s22 + $0x90] sm:$0xff] }
  0x2a   : > { %v353_v61 = vld [vmem:[%s1665_s22 + $0x1e0] sm:$0xff]  ;;  %v334_v2 = vld [vmem:[%s1665_s22 + $0x148] sm:$0xff]  ;;  %v312_v7 = vld [vmem:[%s1665_s22 + $0x98] sm:$0xff] }
  0x2b   : > { %v354_v3 = vld [vmem:[%s1665_s22 + $0x1e8] sm:$0xff]  ;;  %v335_v8 = vld [vmem:[%s1665_s22 + $0x150] sm:$0xff] }
  0x2c   : > { %v355_v9 = vld [vmem:[%s1665_s22 + $0x1f0] sm:$0xff] }
  0x2d   : > { %1301 = vmatmul.msk.f32.gmra.mxu0 %vm365_vm0, %v295_v10  ;;  %1324 = vmatmul.msk.f32.gmra.mxu2 %vm365_vm0, %v318_v11 }
  0x2f   : > { %1344 = vmatmul.msk.f32.gmra.mxu3 %vm365_vm0, %v338_v12 }
  0x35   : > { %1302 = vmatmul.msk.f32.gmra.mxu0 %vm365_vm0, %v296_v13  ;;  %1325 = vmatmul.msk.f32.gmra.mxu2 %vm365_vm0, %v319_v14  ;;  %v313_v13 = vld [vmem:[%s1665_s22 + $0xa0] sm:$0xff]  ;;  %v356_v14 = vld [vmem:[%s1665_s22 + $0x1f8] sm:$0xff] }
  0x37   : > { %1345 = vmatmul.msk.f32.gmra.mxu3 %vm365_vm0, %v339_v15 }
  0x3d   : > { %1303 = vmatmul.msk.f32.gmra.mxu0 %vm365_vm0, %v297_v16  ;;  %1326 = vmatmul.msk.f32.gmra.mxu2 %vm365_vm0, %v320_v17  ;;  %v1810_v16 = vld [vmem:[%s2139_s3] ss:$0 sm:$0xff] }
  0x3f   : > { %1346 = vmatmul.msk.f32.gmra.mxu3 %vm365_vm0, %v340_v18 }
  0x45   : > { %1304 = vmatmul.msk.f32.gmra.mxu0 %vm365_vm0, %v298_v19  ;;  %1327 = vmatmul.msk.f32.gmra.mxu2 %vm365_vm0, %v321_v20  ;;  %v314_v19 = vld [vmem:[%s1665_s22 + $0xa8] sm:$0xff] }
  0x47   : > { %1347 = vmatmul.msk.f32.gmra.mxu3 %vm365_vm0, %v341_v21 }
  0x4d   : > { %1305 = vmatmul.msk.f32.gmra.mxu0 %vm365_vm0, %v299_v22  ;;  %1328 = vmatmul.msk.f32.gmra.mxu2 %vm365_vm0, %v322_v23 }
  0x4f   : > { %1348 = vmatmul.msk.f32.gmra.mxu3 %vm365_vm0, %v342_v24 }
  0x55   : > { %1306 = vmatmul.msk.f32.gmra.mxu0 %vm365_vm0, %v300_v25  ;;  %1329 = vmatmul.msk.f32.gmra.mxu2 %vm365_vm0, %v323_v26 }
  0x57   : > { %1349 = vmatmul.msk.f32.gmra.mxu3 %vm365_vm0, %v343_v27  ;;  %v315_v27 = vld [vmem:[%s1665_s22 + $0xb0] sm:$0xff]  ;;  %s1220_s22 = sshll.u32 %s272_s21, 4  ;;  %s1221_s22 = int_to_ptr.vmem [resolvable:$true] %s1220_s22 }
  0x5d   : > { %1307 = vmatmul.msk.f32.gmra.mxu0 %vm365_vm0, %v301_v28  ;;  %1330 = vmatmul.msk.f32.gmra.mxu2 %vm365_vm0, %v324_v29 }
  0x5f   : > { %1350 = vmatmul.msk.f32.gmra.mxu3 %vm365_vm0, %v344_v30 }
  0x65   : > { %1308 = vmatmul.msk.f32.gmra.mxu0 %vm365_vm0, %v302_v31  ;;  %1331 = vmatmul.msk.f32.gmra.mxu2 %vm365_vm0, %v325_v32 }
  0x67   : > { %1351 = vmatmul.msk.f32.gmra.mxu3 %vm365_vm0, %v345_v33 }
  0x6d   : > { %1309 = vmatmul.msk.f32.gmra.mxu0 %vm365_vm0, %v303_v34  ;;  %1332 = vmatmul.msk.f32.gmra.mxu2 %vm365_vm0, %v326_v35 }
  0x6f   : > { %1352 = vmatmul.msk.f32.gmra.mxu3 %vm365_vm0, %v346_v36 }
  0x75   : > { %1310 = vmatmul.msk.f32.gmra.mxu0 %vm365_vm0, %v304_v37  ;;  %1333 = vmatmul.msk.f32.gmra.mxu2 %vm365_vm0, %v327_v38 }
  0x77   : > { %1353 = vmatmul.msk.f32.gmra.mxu3 %vm365_vm0, %v347_v39 }
  0x7d   : > { %1311 = vmatmul.msk.f32.gmra.mxu0 %vm365_vm0, %v305_v40  ;;  %1334 = vmatmul.msk.f32.gmra.mxu2 %vm365_vm0, %v328_v41 }
  0x7f   : > { %1354 = vmatmul.msk.f32.gmra.mxu3 %vm365_vm0, %v348_v42 }
  0x85   : > { %1312 = vmatmul.msk.f32.gmra.mxu0 %vm365_vm0, %v306_v43  ;;  %1335 = vmatmul.msk.f32.gmra.mxu2 %vm365_vm0, %v329_v44 }
  0x87   : > { %1355 = vmatmul.msk.f32.gmra.mxu3 %vm365_vm0, %v349_v45 }
  0x8d   : > { %1313 = vmatmul.msk.f32.gmra.mxu0 %vm365_vm0, %v307_v46  ;;  %1336 = vmatmul.msk.f32.gmra.mxu2 %vm365_vm0, %v330_v47 }
  0x8f   : > { %1356 = vmatmul.msk.f32.gmra.mxu3 %vm365_vm0, %v350_v48 }
  0x95   : > { %1314 = vmatmul.msk.f32.gmra.mxu0 %vm365_vm0, %v308_v49  ;;  %1337 = vmatmul.msk.f32.gmra.mxu2 %vm365_vm0, %v331_v50 }
  0x97   : > { %1357 = vmatmul.msk.f32.gmra.mxu3 %vm365_vm0, %v351_v51 }
  0x9a   : > { %v1763_v52 = vpop.f32.mrf.mxu0 }
  0x9d   : > { %1315 = vmatmul.msk.f32.gmra.mxu0 %vm365_vm0, %v309_v53  ;;  %1338 = vmatmul.msk.f32.gmra.mxu2 %vm365_vm0, %v332_v54 }
  0x9f   : > { %1358 = vmatmul.msk.f32.gmra.mxu3 %vm365_vm0, %v352_v55 }
  0xa0   : > { %v1771_v56 = vpop.f32.mrf.mxu2 }
  0xa2   : > { %v1773_v57 = vpop.f32.mrf.mxu0  ;;  %v704_v58 = vpop.f32.mrf.mxu3 }
  0xa3   : > { %v705_v32 = vadd.f32 %v1810_v16, %v704_v58 }
  0xa5   : > { %1316 = vmatmul.msk.f32.gmra.mxu0 %vm365_vm0, %v310_v59  ;;  %1339 = vmatmul.msk.f32.gmra.mxu2 %vm365_vm0, %v333_v60  ;;  %v810_v36 = vmax.f32 %v705_v32, 0.0 }
  0xa7   : > { %1359 = vmatmul.msk.f32.gmra.mxu3 %vm365_vm0, %v353_v61 }
  0xa8   : > { %v1781_v62 = vpop.f32.mrf.mxu2 }
  0xaa   : > { %v1783_v63 = vpop.f32.mrf.mxu0  ;;  %v707_v0 = vpop.f32.mrf.mxu3 }
  0xab   : > { %v708_v29 = vadd.f32 %v1810_v16, %v707_v0 }
  0xad   : > { %1317 = vmatmul.msk.f32.gmra.mxu0 %vm365_vm0, %v311_v1  ;;  %1340 = vmatmul.msk.f32.gmra.mxu2 %vm365_vm0, %v334_v2  ;;  %v811_v33 = vmax.f32 %v708_v29, 0.0 }
  0xaf   : > { %1360 = vmatmul.msk.f32.gmra.mxu3 %vm365_vm0, %v354_v3 }
  0xb0   : > { %v1791_v4 = vpop.f32.mrf.mxu2 }
  0xb1   : > { %v651_v1 = vadd.f32 %v1810_v16, %v1791_v4 }
  0xb2   : > { %v1793_v5 = vpop.f32.mrf.mxu0  ;;  %v710_v6 = vpop.f32.mrf.mxu3 }
  0xb3   : > { %v711_v25 = vadd.f32 %v1810_v16, %v710_v6 }
  0xb5   : > { %1318 = vmatmul.msk.f32.gmra.mxu0 %vm365_vm0, %v312_v7  ;;  %1341 = vmatmul.msk.f32.gmra.mxu2 %vm365_vm0, %v335_v8  ;;  %v812_v30 = vmax.f32 %v711_v25, 0.0  ;;  %v648_v8 = vadd.f32 %v1810_v16, %v1781_v62 }
  0xb7   : > { %1361 = vmatmul.msk.f32.gmra.mxu3 %vm365_vm0, %v355_v9  ;;  %v792_v9 = vmax.f32 %v651_v1, 0.0 }
  0xb8   : > { %v653_v10 = vpop.f32.mrf.mxu2 }
  0xb9   : > { %v654_v61 = vadd.f32 %v1810_v16, %v653_v10  ;;  %v645_v10 = vadd.f32 %v1810_v16, %v1771_v56 }
  0xba   : > { %v1801_v11 = vpop.f32.mrf.mxu0  ;;  %v713_v12 = vpop.f32.mrf.mxu3 }
  0xbb   : > { %v714_v20 = vadd.f32 %v1810_v16, %v713_v12  ;;  %v793_v2 = vmax.f32 %v654_v61, 0.0  ;;  %v791_v12 = vmax.f32 %v648_v8, 0.0 }
  0xbd   : > { %1319 = vmatmul.msk.f32.gmra.mxu0 %vm365_vm0, %v313_v13  ;;  %v813_v23 = vmax.f32 %v714_v20, 0.0 }
  0xbf   : > { %1362 = vmatmul.msk.f32.gmra.mxu3 %vm365_vm0, %v356_v14 }
  0xc0   : > { %v656_v15 = vpop.f32.mrf.mxu2 }
  0xc1   : > { %v657_v55 = vadd.f32 %v1810_v16, %v656_v15  ;;  %v790_v15 = vmax.f32 %v645_v10, 0.0 }
  0xc2   : > { %v1812_v17 = vpop.f32.mrf.mxu0  ;;  %v716_v18 = vpop.f32.mrf.mxu3 }
  0xc3   : > { %v717_v21 = vadd.f32 %v1810_v16, %v716_v18  ;;  %v794_v0 = vmax.f32 %v657_v55, 0.0 }
  0xc5   : > { %v814_v22 = vmax.f32 %v717_v21, 0.0  ;;  %1320 = vmatmul.msk.f32.gmra.mxu0 %vm365_vm0, %v314_v19 }
  0xc7   : > { %1397 = vmatpush.xpose.msk.msrb.mxu3 %vm365_vm0, %v814_v22 }
  0xc8   : > { %v659_v24 = vpop.f32.mrf.mxu2 }
  0xc9   : > { %v660_v49 = vadd.f32 %v1810_v16, %v659_v24 }
  0xca   : > { %v1820_v26 = vpop.f32.mrf.mxu0  ;;  %v1823_v28 = vpop.f32.mrf.mxu3 }
  0xcb   : > { %1398 = vmatpush.xpose.msk.msrb.mxu3 %vm365_vm0, %v813_v23  ;;  %v795_v54 = vmax.f32 %v660_v49, 0.0 }
  0xcd   : > { %1321 = vmatmul.msk.f32.gmra.mxu0 %vm365_vm0, %v315_v27 }
  0xcf   : > { %1399 = vmatpush.xpose.msk.msrb.mxu3 %vm365_vm0, %v812_v30 }
  0xd0   : > { %v662_v31 = vpop.f32.mrf.mxu2 }
  0xd1   : > { %v663_v46 = vadd.f32 %v1810_v16, %v662_v31 }
  0xd2   : > { %v1830_v34 = vpop.f32.mrf.mxu0  ;;  %v1832_v35 = vpop.f32.mrf.mxu3 }
  0xd3   : > { %1400 = vmatpush.xpose.msk.msrb.mxu3 %vm365_vm0, %v811_v33  ;;  %v796_v50 = vmax.f32 %v663_v46, 0.0 }
  0xd7   : > { %1401 = vmatpush.xpose.msk.msrb.mxu3 %vm365_vm0, %v810_v36 }
  0xd8   : > { %v665_v37 = vpop.f32.mrf.mxu2 }
  0xd9   : > { %v666_v41 = vadd.f32 %v1810_v16, %v665_v37 }
  0xda   : > { %v1836_v38 = vpop.f32.mrf.mxu0  ;;  %v1838_v39 = vpop.f32.mrf.mxu3 }
  0xdb   : > { %v797_v47 = vmax.f32 %v666_v41, 0.0 }
  0xe0   : > { %v668_v40 = vpop.f32.mrf.mxu2 }
  0xe1   : > { %v669_v42 = vadd.f32 %v1810_v16, %v668_v40 }
  0xe2   : > { %v1842_v43 = vpop.f32.mrf.mxu0  ;;  %v1844_v44 = vpop.f32.mrf.mxu3 }
  0xe3   : > { %v798_v45 = vmax.f32 %v669_v42, 0.0  ;;  %v603_v49 = vadd.f32 %v1810_v16, %v1842_v43  ;;  %v594_v43 = vadd.f32 %v1810_v16, %v1820_v26  ;;  %v588_v26 = vadd.f32 %v1810_v16, %v1801_v11 }
  0xe4   : > { %v582_v11 = vadd.f32 %v1810_v16, %v1783_v63 }
  0xe5   : > { %1380 = vmatpush.xpose.msk.msrb.mxu2 %vm365_vm0, %v798_v45  ;;  %v776_v61 = vmax.f32 %v603_v49, 0.0  ;;  %v773_v10 = vmax.f32 %v594_v43, 0.0 }
  0xe8   : > { %v1848_v48 = vpop.f32.mrf.mxu2 }
  0xe9   : > { %1381 = vmatpush.xpose.msk.msrb.mxu2 %vm365_vm0, %v797_v47 }
  0xea   : > { %v605_v51 = vpop.f32.mrf.mxu0  ;;  %v1852_v53 = vpop.f32.mrf.mxu3 }
  0xeb   : > { %v606_v45 = vadd.f32 %v1810_v16, %v605_v51 }
  0xed   : > { %1382 = vmatpush.xpose.msk.msrb.mxu2 %vm365_vm0, %v796_v50  ;;  %v777_v50 = vmax.f32 %v606_v45, 0.0 }
  0xf0   : > { %v1856_v58 = vpop.f32.mrf.mxu2 }
  0xf1   : > { %1383 = vmatpush.xpose.msk.msrb.mxu2 %vm365_vm0, %v795_v54 }
  0xf2   : > { %v608_v59 = vpop.f32.mrf.mxu0  ;;  %v1859_v60 = vpop.f32.mrf.mxu3 }
  0xf3   : > { %v609_v37 = vadd.f32 %v1810_v16, %v608_v59  ;;  %v600_v59 = vadd.f32 %v1810_v16, %v1836_v38 }
  0xf5   : > { %1384 = vmatpush.xpose.msk.msrb.mxu2 %vm365_vm0, %v794_v0  ;;  %v778_v46 = vmax.f32 %v609_v37, 0.0  ;;  %v597_v0 = vadd.f32 %v1810_v16, %v1830_v34  ;;  %v775_v1 = vmax.f32 %v600_v59, 0.0 }
  0xf8   : > { %v1865_v3 = vpop.f32.mrf.mxu2 }
  0xf9   : > { %1385 = vmatpush.xpose.msk.msrb.mxu2 %vm365_vm0, %v793_v2 }
  0xfa   : > { %v611_v6 = vpop.f32.mrf.mxu0  ;;  %v1868_v7 = vpop.f32.mrf.mxu3 }
  0xfb   : > { %v612_v32 = vadd.f32 %v1810_v16, %v611_v6  ;;  %v774_v6 = vmax.f32 %v597_v0, 0.0 }
  0xfd   : > { %1386 = vmatpush.xpose.msk.msrb.mxu2 %vm365_vm0, %v792_v9  ;;  %v779_v40 = vmax.f32 %v612_v32, 0.0  ;;  %v591_v9 = vadd.f32 %v1810_v16, %v1812_v17 }
 0x100   : > { %v1875_v13 = vpop.f32.mrf.mxu2 }
 0x101   : > { %1387 = vmatpush.xpose.msk.msrb.mxu2 %vm365_vm0, %v791_v12 }
 0x102   : > { %v614_v4 = vpop.f32.mrf.mxu0  ;;  %v1878_v14 = vpop.f32.mrf.mxu3 }
 0x103   : > { %v615_v27 = vadd.f32 %v1810_v16, %v614_v4 }
 0x105   : > { %1388 = vmatpush.xpose.msk.msrb.mxu2 %vm365_vm0, %v790_v15  ;;  %v780_v33 = vmax.f32 %v615_v27, 0.0 }
 0x108   : > { %v1881_v18 = vpop.f32.mrf.mxu2 }
 0x10a   : > { %v617_v62 = vpop.f32.mrf.mxu0  ;;  %v1883_v19 = vpop.f32.mrf.mxu3 }
 0x10b   : > { %v618_v23 = vadd.f32 %v1810_v16, %v617_v62  ;;  %v772_v62 = vmax.f32 %v591_v9, 0.0 }
 0x10d   : > { %v781_v29 = vmax.f32 %v618_v23, 0.0  ;;  %v585_v23 = vadd.f32 %v1810_v16, %v1793_v5  ;;  %v579_v5 = vadd.f32 %v1810_v16, %v1773_v57  ;;  %v576_v57 = vadd.f32 %v1810_v16, %v1763_v52 }
 0x10f   : > { %v768_v59 = vmax.f32 %v579_v5, 0.0 }
 0x110   : > { %v1885_v20 = vpop.f32.mrf.mxu2 }
 0x112   : > { %v620_v21 = vpop.f32.mrf.mxu0  ;;  %v1887_v56 = vpop.f32.mrf.mxu3 }
 0x113   : > { %v621_v22 = vadd.f32 %v1810_v16, %v620_v21 }
 0x115   : > { %v782_v24 = vmax.f32 %v621_v22, 0.0 }
 0x117   : > { %1363 = vmatpush.xpose.msk.msra.mxu1 %vm365_vm0, %v782_v24  ;;  %v771_v24 = vmax.f32 %v588_v26, 0.0 }
 0x118   : > { %v689_v25 = vpop.f32.mrf.mxu2 }
 0x11a   : > { %v1893_v30 = vpop.f32.mrf.mxu0  ;;  %v1895_v31 = vpop.f32.mrf.mxu3 }
 0x11b   : > { %1364 = vmatpush.xpose.msk.msra.mxu1 %vm365_vm0, %v781_v29 }
 0x11f   : > { %1365 = vmatpush.xpose.msk.msra.mxu1 %vm365_vm0, %v780_v33  ;;  %v770_v33 = vmax.f32 %v585_v23, 0.0 }
 0x120   : > { %v692_v36 = vpop.f32.mrf.mxu2 }
 0x121   : > { %v693_v27 = vadd.f32 %v1810_v16, %v692_v36  ;;  %v769_v36 = vmax.f32 %v582_v11, 0.0 }
 0x122   : > { %v1901_v41 = vpop.f32.mrf.mxu0  ;;  %v1903_v42 = vpop.f32.mrf.mxu3 }
 0x123   : > { %1366 = vmatpush.xpose.msk.msra.mxu1 %vm365_vm0, %v779_v40  ;;  %v806_v37 = vmax.f32 %v693_v27, 0.0  ;;  %v690_v40 = vadd.f32 %v1810_v16, %v689_v25 }
 0x125   : > { %v805_v63 = vmax.f32 %v690_v40, 0.0 }
 0x127   : > { %1367 = vmatpush.xpose.msk.msra.mxu1 %vm365_vm0, %v778_v46 }
 0x128   : > { %v695_v47 = vpop.f32.mrf.mxu2 }
 0x129   : > { %v696_v21 = vadd.f32 %v1810_v16, %v695_v47  ;;  %v687_v47 = vadd.f32 %v1810_v16, %v1885_v20 }
 0x12a   : > { %v1910_v54 = vpop.f32.mrf.mxu0  ;;  %v1913_v55 = vpop.f32.mrf.mxu3 }
 0x12b   : > { %1368 = vmatpush.xpose.msk.msra.mxu1 %vm365_vm0, %v777_v50  ;;  %v807_v29 = vmax.f32 %v696_v21, 0.0  ;;  %v804_v20 = vmax.f32 %v687_v47, 0.0  ;;  %v630_v26 = vadd.f32 %v1810_v16, %v1910_v54  ;;  %v627_v54 = vadd.f32 %v1810_v16, %v1901_v41 }
 0x12c   : > { %v750_v41 = vadd.f32 %v1810_v16, %v1895_v31 }
 0x12d   : > { %v784_v27 = vmax.f32 %v627_v54, 0.0 }
 0x12e   : > { %v825_v11 = vmax.f32 %v750_v41, 0.0 }
 0x12f   : > { %1369 = vmatpush.xpose.msk.msra.mxu1 %vm365_vm0, %v776_v61 }
 0x130   : > { %v698_v51 = vpop.f32.mrf.mxu2 }
 0x131   : > { %v699_v12 = vadd.f32 %v1810_v16, %v698_v51  ;;  %v684_v51 = vadd.f32 %v1810_v16, %v1881_v18 }
 0x132   : > { %v632_v2 = vpop.f32.mrf.mxu0  ;;  %v1923_v8 = vpop.f32.mrf.mxu3 }
 0x133   : > { %1370 = vmatpush.xpose.msk.msra.mxu1 %vm365_vm0, %v775_v1  ;;  %v808_v22 = vmax.f32 %v699_v12, 0.0  ;;  %v803_v9 = vmax.f32 %v684_v51, 0.0  ;;  %v633_v18 = vadd.f32 %v1810_v16, %v632_v2  ;;  %v759_v12 = vadd.f32 %v1810_v16, %v1923_v8  ;;  %v1981_v2 = vld [vmem:[%s2140_s4] sm:$0x1] }
 0x135   : > { %v828_v8 = vmax.f32 %v759_v12, 0.0 }
 0x137   : > { %1371 = vmatpush.xpose.msk.msra.mxu1 %vm365_vm0, %v774_v6  ;;  %v767_v6 = vmax.f32 %v576_v57, 0.0 }
 0x138   : > { %v701_v38 = vpop.f32.mrf.mxu2 }
 0x139   : > { %v702_v34 = vadd.f32 %v1810_v16, %v701_v38  ;;  %v681_v38 = vadd.f32 %v1810_v16, %v1875_v13 }
 0x13a   : > { %v635_v4 = vpop.f32.mrf.mxu0  ;;  %v761_v17 = vpop.f32.mrf.mxu3 }
 0x13b   : > { %v809_v15 = vmax.f32 %v702_v34, 0.0  ;;  %1372 = vmatpush.xpose.msk.msra.mxu1 %vm365_vm0, %v773_v10  ;;  %v636_v0 = vadd.f32 %v1810_v16, %v635_v4  ;;  %v762_v52 = vadd.f32 %v1810_v16, %v761_v17  ;;  %v678_v4 = vadd.f32 %v1810_v16, %v1865_v3 }
 0x13c   : > { %v802_v13 = vmax.f32 %v681_v38, 0.0  ;;  %v756_v3 = vadd.f32 %v1810_v16, %v1913_v55  ;;  %v753_v17 = vadd.f32 %v1810_v16, %v1903_v42  ;;  %v672_v55 = vadd.f32 %v1810_v16, %v1848_v48 }
 0x13d   : > { %1402 = vmatpush.xpose.msk.msrb.mxu3 %vm365_vm0, %v809_v15  ;;  %v787_v10 = vmax.f32 %v636_v0, 0.0  ;;  %v829_v34 = vmax.f32 %v762_v52, 0.0  ;;  %v786_v15 = vmax.f32 %v633_v18, 0.0  ;;  %v801_v21 = vmax.f32 %v678_v4, 0.0 }
 0x13e   : > { %v827_v23 = vmax.f32 %v756_v3, 0.0  ;;  %v799_v42 = vmax.f32 %v672_v55, 0.0 }
 0x13f   : > { %1373 = vmatpush.xpose.msk.msra.mxu1 %vm365_vm0, %v772_v62  ;;  %v675_v62 = vadd.f32 %v1810_v16, %v1856_v58  ;;  %v624_v58 = vadd.f32 %v1810_v16, %v1893_v30  ;;  %v744_v30 = vadd.f32 %v1810_v16, %v1883_v19  ;;  %v735_v19 = vadd.f32 %v1810_v16, %v1859_v60 }
 0x140   : > { %v723_v60 = vadd.f32 %v1810_v16, %v1832_v35 }
 0x141   : > { %1403 = vmatpush.xpose.msk.msrb.mxu3 %vm365_vm0, %v808_v22  ;;  %v785_v22 = vmax.f32 %v630_v26, 0.0  ;;  %v783_v48 = vmax.f32 %v624_v58, 0.0 }
 0x142   : > { %v638_v32 = vpop.f32.mrf.mxu0  ;;  %v764_v45 = vpop.f32.mrf.mxu3 }
 0x143   : > { %1374 = vmatpush.xpose.msk.msra.mxu1 %vm365_vm0, %v771_v24  ;;  %v639_v49 = vadd.f32 %v1810_v16, %v638_v32  ;;  %v765_v25 = vadd.f32 %v1810_v16, %v764_v45  ;;  %v800_v24 = vmax.f32 %v675_v62, 0.0  ;;  %v747_v32 = vadd.f32 %v1810_v16, %v1887_v56 }
 0x144   : > { %v741_v56 = vadd.f32 %v1810_v16, %v1878_v14  ;;  %v820_v45 = vmax.f32 %v735_v19, 0.0  ;;  %v729_v14 = vadd.f32 %v1810_v16, %v1844_v44 }
 0x145   : > { %1404 = vmatpush.xpose.msk.msrb.mxu3 %vm365_vm0, %v807_v29  ;;  %v788_v1 = vmax.f32 %v639_v49, 0.0  ;;  %v830_v43 = vmax.f32 %v765_v25, 0.0  ;;  %v826_v29 = vmax.f32 %v753_v17, 0.0  ;;  %v824_v31 = vmax.f32 %v747_v32, 0.0 }
 0x146   : > { %v822_v40 = vmax.f32 %v741_v56, 0.0  ;;  %v818_v47 = vmax.f32 %v729_v14, 0.0  ;;  %v816_v49 = vmax.f32 %v723_v60, 0.0 }
 0x147   : > { %1375 = vmatpush.xpose.msk.msra.mxu1 %vm365_vm0, %v770_v33  ;;  %v823_v33 = vmax.f32 %v744_v30, 0.0 }
 0x149   : > { %1405 = vmatpush.xpose.msk.msrb.mxu3 %vm365_vm0, %v806_v37  ;;  %v738_v37 = vadd.f32 %v1810_v16, %v1868_v7  ;;  %v726_v7 = vadd.f32 %v1810_v16, %v1838_v39 }
 0x14a   : > { %v641_v46 = vpop.f32.mrf.mxu0 }
 0x14b   : > { %v642_v50 = vadd.f32 %v1810_v16, %v641_v46  ;;  %1376 = vmatpush.xpose.msk.msra.mxu1 %vm365_vm0, %v769_v36  ;;  %v821_v5 = vmax.f32 %v738_v37, 0.0  ;;  %v732_v36 = vadd.f32 %v1810_v16, %v1852_v53  ;;  %v720_v53 = vadd.f32 %v1810_v16, %v1823_v28 }
 0x14d   : > { %v789_v61 = vmax.f32 %v642_v50, 0.0  ;;  %1406 = vmatpush.xpose.msk.msrb.mxu3 %vm365_vm0, %v805_v63  ;;  %v819_v46 = vmax.f32 %v732_v36, 0.0  ;;  %v817_v63 = vmax.f32 %v726_v7, 0.0  ;;  %v815_v44 = vmax.f32 %v720_v53, 0.0 }
 0x14e   : > { %v833_v50 = vstv %s832_s11 }
 0x14f   : > { %1377 = vmatpush.xpose.msk.msra.mxu1 %vm365_vm0, %v768_v59  ;;  %1389 = vmatpush.xpose.msk.msrb.mxu2 %vm365_vm0, %v789_v61 }
 0x151   : > { %1407 = vmatpush.xpose.msk.msrb.mxu3 %vm365_vm0, %v804_v20 }
 0x153   : > { %1378 = vmatpush.xpose.msk.msra.mxu1 %vm365_vm0, %v767_v6  ;;  %1390 = vmatpush.xpose.msk.msrb.mxu2 %vm365_vm0, %v788_v1 }
 0x155   : > { %1408 = vmatpush.xpose.msk.msrb.mxu3 %vm365_vm0, %v803_v9 }
 0x156   : > { %1379 = vmatmul.msk.f32.vlgmr.msra.gmra.mxu1 %vm365_vm0, %v1981_v2 }
 0x157   : > { %1414 = vmatpush.xpose.msk.msrb.mxu1 %vm365_vm0, %v830_v43  ;;  %1391 = vmatpush.xpose.msk.msrb.mxu2 %vm365_vm0, %v787_v10 }
 0x159   : > { %1409 = vmatpush.xpose.msk.msrb.mxu3 %vm365_vm0, %v802_v13 }
 0x15b   : > { %1415 = vmatpush.xpose.msk.msrb.mxu1 %vm365_vm0, %v829_v34  ;;  %1392 = vmatpush.xpose.msk.msrb.mxu2 %vm365_vm0, %v786_v15 }
 0x15d   : > { %1410 = vmatpush.xpose.msk.msrb.mxu3 %vm365_vm0, %v801_v21 }
 0x15f   : > { %1416 = vmatpush.xpose.msk.msrb.mxu1 %vm365_vm0, %v828_v8  ;;  %1393 = vmatpush.xpose.msk.msrb.mxu2 %vm365_vm0, %v785_v22 }
 0x161   : > { %1411 = vmatpush.xpose.msk.msrb.mxu3 %vm365_vm0, %v800_v24 }
 0x163   : > { %1417 = vmatpush.xpose.msk.msrb.mxu1 %vm365_vm0, %v827_v23  ;;  %1394 = vmatpush.xpose.msk.msrb.mxu2 %vm365_vm0, %v784_v27 }
 0x165   : > { %1412 = vmatpush.xpose.msk.msrb.mxu3 %vm365_vm0, %v799_v42 }
 0x167   : > { %1418 = vmatpush.xpose.msk.msrb.mxu1 %vm365_vm0, %v826_v29  ;;  %1395 = vmatpush.xpose.msk.msrb.mxu2 %vm365_vm0, %v783_v48 }
 0x168   : > { %1413 = vmatmul.msk.f32.vlgmr.msrb.gmra.mxu3 %vm365_vm0, %v1981_v2 }
 0x16a   : > { %1396 = vmatmul.msk.f32.vlgmr.msrb.gmra.mxu2 %vm365_vm0, %v1981_v2 }
 0x16b   : > { %1419 = vmatpush.xpose.msk.msrb.mxu1 %vm365_vm0, %v825_v11 }
 0x16f   : > { %1420 = vmatpush.xpose.msk.msrb.mxu1 %vm365_vm0, %v824_v31 }
 0x173   : > { %1421 = vmatpush.xpose.msk.msrb.mxu1 %vm365_vm0, %v823_v33 }
 0x177   : > { %1422 = vmatpush.xpose.msk.msrb.mxu1 %vm365_vm0, %v822_v40 }
 0x17b   : > { %1423 = vmatpush.xpose.msk.msrb.mxu1 %vm365_vm0, %v821_v5 }
 0x17f   : > { %1424 = vmatpush.xpose.msk.msrb.mxu1 %vm365_vm0, %v820_v45 }
 0x183   : > { %1425 = vmatpush.xpose.msk.msrb.mxu1 %vm365_vm0, %v819_v46 }
 0x187   : > { %1426 = vmatpush.xpose.msk.msrb.mxu1 %vm365_vm0, %v818_v47 }
 0x18b   : > { %1427 = vmatpush.xpose.msk.msrb.mxu1 %vm365_vm0, %v817_v63 }
 0x18f   : > { %1428 = vmatpush.xpose.msk.msrb.mxu1 %vm365_vm0, %v816_v49 }
 0x193   : > { %1429 = vmatpush.xpose.msk.msrb.mxu1 %vm365_vm0, %v815_v44  ;;  %v1181_v44 = vld [vmem:[%s290_s15] sm:$0xf] }
 0x196   : > { %1430 = vmatmul.msk.f32.vlgmr.msrb.gmra.mxu1 %vm365_vm0, %v1981_v2 }
 0x1d3   : > { %v1046_v39 = vpop.f32.mrf.mxu1 }
 0x1d4   : > { %v1047_v35 = vadd.f32 %v1046_v39, %v833_v50 }
 0x1d6   : > { %v1109_v51 = vsub.f32 0.0, %v1047_v35 }
 0x1d8   : > { %v1113_v28 = vmul.f32 1.442695, %v1109_v51  ;;  %v1182_v51 = vand.u32 2, %v1181_v44 }
 0x1da   : > { %1483 = vpow2.f32 %v1113_v28  ;;  %v1202_v28 = vlaneseq }
 0x1e0   : > { %v1484_v43 = vpop.eup %1483 }
 0x1e1   : > { %v1121_v38 = vadd.f32 1.0, %v1484_v43 }
 0x1e3   : > { %vm1130_vm1 = vweird.f32 %v1121_v38  ;;  %v1134_v41 = vand.u32 2147483647, %v1121_v38  ;;  %v1136_v11 = vand.u32 2147483648, %v1121_v38 }
 0x1e5   : > { %vm2082_vm11 = vcmp.eq.f32.partialorder %v1134_v41, 8.507059e+37  ;;  %v1137_v60 = vor.u32 1.1754944e-38, %v1136_v11 }
 0x1eb   : > { %v1086_v57 = vpop.f32.mrf.mxu3 }
 0x1ec   : > { %v1087_v61 = vadd.f32 %v1086_v57, %v833_v50 }
 0x1ed   : > { %v1066_v25 = vpop.f32.mrf.mxu2 }
 0x1ee   : > { %v1067_v59 = vadd.f32 %v1066_v25, %v833_v50  ;;  %v1111_v16 = vsub.f32 0.0, %v1087_v61 }
 0x1f0   : > { %v1110_v20 = vsub.f32 0.0, %v1067_v59  ;;  %v1117_v1 = vmul.f32 1.442695, %v1111_v16  ;;  %v1184_v59 = vand.u32 1, %v1181_v44 }
 0x1f2   : > { %v1115_v0 = vmul.f32 1.442695, %v1110_v20 }
 0x1f4   : > { %1485 = vpow2.f32 %v1115_v0 }
 0x1f5   : > { %1487 = vpow2.f32 %v1117_v1 }
 0x1f6   : > { %1489 = vrcp.f32 %v1121_v38 }
 0x1fa   : > { %v1486_v6 = vpop.eup %1485 }
 0x1fb   : > { %v1488_v52 = vpop.eup %1487  ;;  %v1122_v9 = vadd.f32 1.0, %v1486_v6 }
 0x1fc   : > { %v1123_v18 = vadd.f32 1.0, %v1488_v52  ;;  %v2049_v4 = vpop.eup %1489 }
 0x1fd   : > { %1491 = vrcp.f32 %v1122_v9  ;;  %v1126_v26 = vmul.f32 %v2049_v4, %v1121_v38  ;;  %vm1131_vm2 = vweird.f32 %v2049_v4  ;;  %vm1144_vm3 = vweird.f32 %v1122_v9 }
 0x1fe   : > { %1493 = vrcp.f32 %v1123_v18  ;;  %v1150_v58 = vand.u32 2147483648, %v1122_v9  ;;  %v1148_v42 = vand.u32 2147483647, %v1122_v9  ;;  %vm1158_vm5 = vweird.f32 %v1123_v18  ;;  %vm2062_vm7 = vmor %vm1130_vm1, %vm1131_vm2 }
 0x1ff   : > { %v1127_v62 = vsub.f32 1.0, %v1126_v26  ;;  %v1162_v31 = vand.u32 2147483647, %v1123_v18  ;;  %v1164_v56 = vand.u32 2147483648, %v1123_v18  ;;  %vm1193_vm1 = vcmask 1040384  }
 0x200   : > { %v1151_v40 = vor.u32 1.1754944e-38, %v1150_v58  ;;  %vm1149_vm10 = vcmp.eq.f32.partialorder %v1148_v42, 8.507059e+37  ;;  %vm1195_vm2 = vcmask 1042434  }
 0x201   : > { %v1128_v23 = vmul.f32 %v2049_v4, %v1127_v62  ;;  %vm2088_vm12 = vcmp.eq.f32.partialorder %v1162_v31, 8.507059e+37  ;;  %v1165_v7 = vor.u32 1.1754944e-38, %v1164_v56 }
 0x203   : > { %v1492_v15 = vpop.eup %1491  ;;  %v1129_v27 = vadd.f32 %v2049_v4, %v1128_v23 }
 0x204   : > { %v1494_v2 = vpop.eup %1493  ;;  %v1140_v3 = vmul.f32 %v1492_v15, %v1122_v9  ;;  %vm1145_vm4 = vweird.f32 %v1492_v15 }
 0x205   : > { %v1154_v8 = vmul.f32 %v1494_v2, %v1123_v18  ;;  %vm1159_vm6 = vweird.f32 %v1494_v2  ;;  %vm2066_vm8 = vmor %vm1144_vm3, %vm1145_vm4  ;;  %v1133_v5 = vsel %vm2062_vm7, %v2049_v4, %v1129_v27  ;;  %vm1197_vm3 = vcmask 1041408  }
 0x206   : > { %v1141_v54 = vsub.f32 1.0, %v1140_v3  ;;  %vm2070_vm9 = vmor %vm1158_vm5, %vm1159_vm6  ;;  %v1138_v35 = vsel %vm2082_vm11, %v1137_v60, %v1133_v5  ;;  %vm1185_vm4 = vcmp.ne.s32.totalorder %v1184_v59, 0  ;;  %vm1183_vm5 = vcmp.ne.s32.totalorder %v1182_v51, 0 }
 0x207   : > { %v1155_v17 = vsub.f32 1.0, %v1154_v8  ;;  %vm1204_vm6 = vcmp.lt.s32.totalorder %v1202_v28, 512 }
 0x208   : > { %v1142_v55 = vmul.f32 %v1492_v15, %v1141_v54 }
 0x209   : > { %v1156_v24 = vmul.f32 %v1494_v2, %v1155_v17 }
 0x20a   : > { %v1143_v29 = vadd.f32 %v1492_v15, %v1142_v55 }
 0x20b   : > { %v1157_v33 = vadd.f32 %v1494_v2, %v1156_v24 }
 0x20c   : > { %v1147_v14 = vsel %vm2066_vm8, %v1492_v15, %v1143_v29 }
 0x20d   : > { %v1161_v49 = vsel %vm2070_vm9, %v1494_v2, %v1157_v33  ;;  %v1152_v39 = vsel %vm1149_vm10, %v1151_v40, %v1147_v14 }
 0x20e   : > { %v1166_v57 = vsel %vm2088_vm12, %v1165_v7, %v1161_v49  ;;  %v1190_v20 = vrot.slane %v1152_v39, 7 }
 0x20f   : > { %v1191_v0 = vrot.slane %v1166_v57, 6 }
 0x210   : > { %v1194_v43 = vsel %vm1193_vm1, %v1138_v35, %v1190_v20 }
 0x213   : > { %v1106_v10 = vpop.f32.mrf.mxu1 }
 0x214   : > { %v1107_v12 = vadd.f32 %v1106_v10, %v833_v50 }
 0x216   : > { %v1112_v34 = vsub.f32 0.0, %v1107_v12 }
 0x218   : > { %v1119_v13 = vmul.f32 1.442695, %v1112_v34 }
 0x21a   : > { %1495 = vpow2.f32 %v1119_v13 }
 0x220   : > { %v1496_v21 = vpop.eup %1495 }
 0x221   : > { %v1124_v22 = vadd.f32 1.0, %v1496_v21 }
 0x223   : > { %1497 = vrcp.f32 %v1124_v22  ;;  %v1178_v47 = vand.u32 2147483648, %v1124_v22  ;;  %v1176_v53 = vand.u32 2147483647, %v1124_v22  ;;  %vm1172_vm14 = vweird.f32 %v1124_v22 }
 0x225   : > { %v1179_v25 = vor.u32 1.1754944e-38, %v1178_v47  ;;  %vm1177_vm0 = vcmp.eq.f32.partialorder %v1176_v53, 8.507059e+37 }
 0x229   : > { %v1498_v32 = vpop.eup %1497 }
 0x22a   : > { %v1168_v37 = vmul.f32 %v1498_v32, %v1124_v22  ;;  %vm1173_vm13 = vweird.f32 %v1498_v32 }
 0x22b   : > { %vm1174_vm15 = vmor %vm1172_vm14, %vm1173_vm13 }
 0x22c   : > { %v1169_v36 = vsub.f32 1.0, %v1168_v37 }
 0x22e   : > { %v1170_v63 = vmul.f32 %v1498_v32, %v1169_v36 }
 0x230   : > { %v1171_v50 = vadd.f32 %v1498_v32, %v1170_v63 }
 0x232   : > { %v1175_v61 = vsel %vm1174_vm15, %v1498_v32, %v1171_v50 }
 0x233   : > { %v1180_v16 = vsel %vm1177_vm0, %v1179_v25, %v1175_v61 }
 0x234   : > { %v1192_v1 = vrot.slane %v1180_v16, 5 }
 0x236   : > { %v1196_v6 = vsel %vm1195_vm2, %v1191_v0, %v1192_v1 }
 0x237   : > { %v1198_v52 = vsel %vm1197_vm3, %v1194_v43, %v1196_v6 }
 0x238   : > { %v1200_v38 = vsel %vm1185_vm4, 1.0, %v1198_v52 }
 0x239   : > { %v1201_v9 = vsel %vm1183_vm5, 0.0, %v1200_v38 }
 0x23a   : > { %1206 = vst.msk [vmem:[%s272_s21] sm:$0xf] %vm1204_vm6, %v1201_v9 }
 0x23b   : > { %1526 = shalt.err (!%p1523_p4)
}
 0x23c   : > { %1443 = dma.vmem_to_hbm [thread:$0]  (%p1639_p5), %s1221_s22, 64, %s1223_s27, %s1208_s29  }
 0x23d PF: > { %p1449_p7 = scmp.ge.s32.totalorder %s1561_s26, 2  ;;  %s1234_s15 = sand.u32 1, %s1549_s23  }
 0x23e   : > { %s1235_s16 = scalar_lea.sflag [#allocation4], %s1234_s15 }
 0x23f   : > { %p1446_p8 = pnand %p1449_p7, %p1643_p6 }
 0x241   : > { %p1447_p9 = pneg %p1446_p8 }
 0x243   : > { %1544 = dma.done.wait (%p1447_p9), %s1235_s16, 64  }
 0x244   : > { %1546 = vsyncadd (%p1447_p9), %s1235_s16, 4294967232  ;;  %p17_p10 = scmp.ge.s32.totalorder %s1626_s28, 4   ;;  %s2155_s23 = smov %s1553_s24 }
 0x245   : > { %s2156_s24 = smov %s1557_s25  ;;  %s2157_s25 = smov %s1637_s7 }
 0x246   : > { %s2158_s26 = smov %s1626_s28  ;;  %19 = sbr.rel (!%p17_p10) target bundleno = 5 (0x5), region = 82 }
 0x24b   :  { %1241 = vsyncpa [#allocation4], 1 }
 0x24c   :  { %1243 = vsyncpa [#allocation4 + $0x1], 1 }

</bundles_post_ra>
